<compile_context>
chip_gen: v7x
topology: tpu7x:2x2x1
jax: 0.10.0
libtpu: 0.0.40
codegen_flags: <defaults>
</compile_context>

<pallas_src>
import functools

import jax
import jax.numpy as jnp
import numpy as np
from jax.experimental import pallas as pl
from jax.experimental.pallas import tpu as pltpu


def _attention_kernel(x_ref, wqkv_ref, wproj_ref, bproj_ref, o_ref, *,
                      num_head, bn_tile, seq_len, is_proj):
    # x_ref:    (M, C) with M = bn_tile * seq_len, rows ordered (bn, s), fp32.
    # wqkv_ref: (C, 3C)  wproj_ref: (C, C)   (bf16 or fp32; MXU operand dtype)
    # bproj_ref:(1, C)   fp32
    C = x_ref.shape[-1]
    D = C // num_head
    M = bn_tile * seq_len
    mxu_dtype = wqkv_ref.dtype

    x_f32 = x_ref[...].astype(jnp.float32)          # fp32 copy for the residual
    x_mm = x_f32.astype(mxu_dtype)                  # MXU operand copy

    # QKV projection on the whole slab: one big MXU matmul, fp32 accumulation.
    # (q scale is pre-folded into the q columns of Wqkv by the wrapper.)
    qkv = jnp.dot(x_mm, wqkv_ref[...], preferred_element_type=jnp.float32)  # (M, 3C)

    if is_proj:
        wproj = wproj_ref[...]                       # resident, loaded once
        # Start the accumulator with residual + projection bias; per-head
        # contributions are accumulated as (M, D) @ (D, C) matmuls, which is
        # mathematically identical to proj(concat(heads)) but avoids any
        # VMEM scratch / lane-concatenate of 8-lane head tiles.
        acc = x_f32 + bproj_ref[...].astype(jnp.float32)                    # (M, C)

    # Column layout matches torch's reshape(..., 3, num_head, D):
    #   q cols [0:C), k cols [C:2C), v cols [2C:3C); head h -> [h*D:(h+1)*D).
    for h in range(num_head):
        qh = qkv[:, h * D:(h + 1) * D].reshape(bn_tile, seq_len, D)
        kh = qkv[:, C + h * D:C + (h + 1) * D].reshape(bn_tile, seq_len, D)
        vh = qkv[:, 2 * C + h * D:2 * C + (h + 1) * D].reshape(bn_tile, seq_len, D)

        # Batched over the bn_tile samples (single leading batch dim).
        att = jnp.einsum('bqd,bkd->bqk',
                         qh.astype(mxu_dtype), kh.astype(mxu_dtype),
                         preferred_element_type=jnp.float32)   # (bn, S, S) fp32
        att = att - jnp.max(att, axis=-1, keepdims=True)
        p = jnp.exp(att)
        p = p / jnp.sum(p, axis=-1, keepdims=True)             # exact divide, fp32

        oh = jnp.einsum('bqk,bkd->bqd',
                        p.astype(mxu_dtype), vh.astype(mxu_dtype),
                        preferred_element_type=jnp.float32)    # (bn, S, D) fp32
        oh = oh.reshape(M, D)

        if is_proj:
            acc = acc + jnp.dot(oh.astype(mxu_dtype), wproj[h * D:(h + 1) * D, :],
                                preferred_element_type=jnp.float32)
        else:
            # No projection: head output + residual goes straight to its
            # channel slice (non-default path).
            o_ref[:, h * D:(h + 1) * D] = (
                x_f32[:, h * D:(h + 1) * D] + oh).astype(o_ref.dtype)

    if is_proj:
        o_ref[...] = acc.astype(o_ref.dtype)


def _pick_bn_tile(bn, seq_len, *, max_rows=4096, min_steps=2):
    """Pick samples-per-grid-step.

    Preferences (in order):
      * rows-per-step = bn_tile * seq_len stays within `max_rows` (amortizes the
        ~0.35us/step grid overhead and keeps the working set inside the VMEM
        budget, sized for v7x's 64 MiB),
      * at least `min_steps` grid steps so both v7x TensorCores get work,
      * non-full blocks keep the row count a multiple of 8 (sublane tiling).
    """
    total = bn * seq_len
    valid = []
    for d in range(1, bn + 1):
        if bn % d:
            continue
        rows = d * seq_len
        if rows != total and rows % 8 != 0:
            continue
        valid.append(d)
    if not valid:
        return bn
    fitting = [d for d in valid if d * seq_len <= max_rows]
    if not fitting:
        return min(valid)
    multi = [d for d in fitting if bn // d >= min_steps]
    return max(multi) if multi else max(fitting)


def attention_forward(x, wqkv, wproj, bproj, *, num_head, is_proj=True,
                      max_rows=4096, min_grid_steps=2, use_bf16_matmul=True):
    """x: (b, n, c, h, w) float32. Returns (b, n, h*w, c)."""
    b, n, c, hh, ww = x.shape
    S = hh * ww
    BN = b * n
    D = c // num_head
    scale = float(D) ** 0.5   # module: q = q * sqrt(head_dim)

    # flatten(-2).transpose(-1,-2) -> (BN, S, c), rows -> (BN*S, c).
    # TODO(synk): consume the (BN, c, S) layout directly with an in-kernel
    #             transpose to remove this extra HBM pass over the activations.
    x_seq = jnp.transpose(x.reshape(BN, c, S), (0, 2, 1)).reshape(BN * S, c)

    if wproj is None:
        wproj = jnp.zeros((c, c), x.dtype)
    if bproj is None:
        bproj = jnp.zeros((1, c), x.dtype)
    bproj = bproj.reshape(1, c).astype(jnp.float32)

    # Fold the q scale into the q columns of W_qkv (one-off, host side).
    col_scale = jnp.concatenate(
        [jnp.full((c,), scale, wqkv.dtype), jnp.ones((2 * c,), wqkv.dtype)])
    wqkv_scaled = wqkv * col_scale[None, :]

    mxu_dtype = jnp.bfloat16 if use_bf16_matmul else wqkv.dtype
    wqkv_k = wqkv_scaled.astype(mxu_dtype)
    wproj_k = wproj.astype(mxu_dtype)

    bn_tile = _pick_bn_tile(BN, S, max_rows=max_rows, min_steps=min_grid_steps)
    rows = bn_tile * S
    grid = (BN // bn_tile,)

    # Rough per-step live-intermediate footprint (x fp32 + bf16 copy, qkv fp32,
    # per-head logits/probs, accumulator) plus resident weights; used only to
    # set an explicit scoped-VMEM limit with headroom (capped for v7x).
    est_step_bytes = rows * (24 * c + 16 * num_head * S) + 8 * c * c
    vmem_limit = int(min(48 * 1024 * 1024,
                         max(32 * 1024 * 1024, 4 * est_step_bytes)))

    kernel = functools.partial(
        _attention_kernel, num_head=num_head, bn_tile=bn_tile, seq_len=S,
        is_proj=is_proj)

    out2d = pl.pallas_call(
        kernel,
        out_shape=jax.ShapeDtypeStruct((BN * S, c), x.dtype),
        grid_spec=pltpu.PrefetchScalarGridSpec(
            num_scalar_prefetch=0,
            grid=grid,
            in_specs=[
                pl.BlockSpec((rows, c), lambda i: (i, 0)),      # x slab
                pl.BlockSpec((c, 3 * c), lambda i: (0, 0)),     # W_qkv (resident)
                pl.BlockSpec((c, c), lambda i: (0, 0)),         # W_proj (resident)
                pl.BlockSpec((1, c), lambda i: (0, 0)),         # b_proj (resident)
            ],
            out_specs=pl.BlockSpec((rows, c), lambda i: (i, 0)),
        ),
        compiler_params=pltpu.CompilerParams(
            dimension_semantics=("parallel",),
            vmem_limit_bytes=vmem_limit),
    )(x_seq, wqkv_k, wproj_k, bproj)

    return out2d.reshape(b, n, S, c)


def attention_reference(x, wqkv, wproj, bproj, *, num_head, is_proj=True):
    """Pure-JAX reference mirroring the PyTorch forward exactly."""
    b, n, c, hh, ww = x.shape
    S = hh * ww
    D = c // num_head
    scale = (c // num_head) ** 0.5

    xs = jnp.transpose(x.reshape(b * n, c, S), (0, 2, 1))          # (BN, S, C)
    qkv = xs @ wqkv                                                # (BN, S, 3C)
    qkv = qkv.reshape(b * n, S, 3, num_head, D).transpose(2, 0, 3, 1, 4)
    q, k, v = qkv[0], qkv[1], qkv[2]                               # (BN, H, S, D)
    q = q * scale
    attn = q @ jnp.swapaxes(k, -1, -2)                             # (BN, H, S, S)
    attn = jax.nn.softmax(attn, axis=-1)
    out = (attn @ v).transpose(0, 2, 1, 3).reshape(b * n, S, c)
    if is_proj:
        out = out @ wproj + bproj.reshape(1, c)
    out = xs + out
    return out.reshape(b, n, S, c)


if __name__ == "__main__":
    # Small shapes consistent with the module.
    b, n, c, hh, ww = 2, 2, 32, 4, 4
    num_head = 4

    key = jax.random.PRNGKey(0)
    kx, kq, kw, kb = jax.random.split(key, 4)

    x = jax.random.normal(kx, (b, n, c, hh, ww), dtype=jnp.float32)
    # Deterministic synthetic parameters, stored as (in_features, out_features).
    wqkv = jax.random.normal(kq, (c, 3 * c), dtype=jnp.float32) * (1.0 / c)
    wproj = jax.random.normal(kw, (c, c), dtype=jnp.float32) * (1.0 / np.sqrt(c))
    bproj = jax.random.normal(kb, (1, c), dtype=jnp.float32) * 0.02

    ref = attention_reference(x, wqkv, wproj, bproj, num_head=num_head, is_proj=True)

    # fp32-operand path: structural correctness check at tight tolerance.
    out_f32 = attention_forward(x, wqkv, wproj, bproj, num_head=num_head,
                                is_proj=True, use_bf16_matmul=False)
    out_f32 = jax.block_until_ready(out_f32)
    np.testing.assert_allclose(np.asarray(out_f32), np.asarray(ref),
                               rtol=5e-3, atol=5e-3)

    # Default bf16 MXU-operand path (fp32 softmax/residual): relaxed tolerance.
    out_bf16 = attention_forward(x, wqkv, wproj, bproj, num_head=num_head,
                                 is_proj=True, use_bf16_matmul=True)
    out_bf16 = jax.block_until_ready(out_bf16)
    np.testing.assert_allclose(np.asarray(out_bf16), np.asarray(ref),
                               rtol=2e-2, atol=2e-2)

    print("KERNEL_OK")
</pallas_src>

<mosaic_0001>
module attributes {stable_mosaic.version = 11 : i64} {
  func.func @_attention_kernel(%arg0: i32, %arg1: memref<32x32xf32, #tpu.memory_space<vmem>>, %arg2: memref<32x96xf32, #tpu.memory_space<vmem>>, %arg3: memref<32x32xf32, #tpu.memory_space<vmem>>, %arg4: memref<1x32xf32, #tpu.memory_space<vmem>>, %arg5: memref<32x32xf32, #tpu.memory_space<vmem>>) attributes {dimension_semantics = [#tpu.dimension_semantics<parallel>], iteration_bounds = array<i64: 2>, scalar_prefetch = 0 : i64, scratch_operands = 0 : i64, tpu.core_type = #tpu.core_type<tc>, window_params = [{transform_indices = @transform_0, window_bounds = array<i64: 32, 32>}, {pipeline_mode = #tpu.pipeline_mode<synchronous>, transform_indices = @transform_1, window_bounds = array<i64: 32, 96>}, {pipeline_mode = #tpu.pipeline_mode<synchronous>, transform_indices = @transform_2, window_bounds = array<i64: 32, 32>}, {pipeline_mode = #tpu.pipeline_mode<synchronous>, transform_indices = @transform_3, window_bounds = array<i64: 1, 32>}, {transform_indices = @transform_4, window_bounds = array<i64: 32, 32>}]} {
    %c0 = arith.constant 0 : index
    %c0_0 = arith.constant 0 : index
    %0 = vector.load %arg1[%c0, %c0_0] : memref<32x32xf32, #tpu.memory_space<vmem>>, vector<32x32xf32>
    %c0_1 = arith.constant 0 : index
    %c0_2 = arith.constant 0 : index
    %1 = vector.load %arg2[%c0_1, %c0_2] : memref<32x96xf32, #tpu.memory_space<vmem>>, vector<32x96xf32>
    %cst = arith.constant dense<0.000000e+00> : vector<32x96xf32>
    %2 = tpu.matmul %0, %1, %cst {dimension_numbers = #tpu.dot_dimension_numbers<[1], [0], [0], [1], [0, 0, 1, 1], [], []>} : vector<32x32xf32>, vector<32x96xf32>, vector<32x96xf32> -> vector<32x96xf32>
    %c0_3 = arith.constant 0 : index
    %c0_4 = arith.constant 0 : index
    %3 = vector.load %arg3[%c0_3, %c0_4] : memref<32x32xf32, #tpu.memory_space<vmem>>, vector<32x32xf32>
    %c0_5 = arith.constant 0 : index
    %c0_6 = arith.constant 0 : index
    %4 = vector.load %arg4[%c0_5, %c0_6] : memref<1x32xf32, #tpu.memory_space<vmem>>, vector<1x32xf32>
    %5 = vector.broadcast %4 : vector<1x32xf32> to vector<32x32xf32>
    %6 = arith.addf %0, %5 : vector<32x32xf32>
    %7 = vector.extract_strided_slice %2 {offsets = [0, 0], sizes = [32, 8], strides = [1, 1]} : vector<32x96xf32> to vector<32x8xf32>
    %8 = vector.shape_cast %7 : vector<32x8xf32> to vector<2x16x8xf32>
    %9 = vector.extract_strided_slice %2 {offsets = [0, 32], sizes = [32, 8], strides = [1, 1]} : vector<32x96xf32> to vector<32x8xf32>
    %10 = vector.shape_cast %9 : vector<32x8xf32> to vector<2x16x8xf32>
    %11 = vector.extract_strided_slice %2 {offsets = [0, 64], sizes = [32, 8], strides = [1, 1]} : vector<32x96xf32> to vector<32x8xf32>
    %12 = vector.shape_cast %11 : vector<32x8xf32> to vector<2x16x8xf32>
    "tpu.trace_start"() <{level = 10 : i32, message = "bqd,bkd->bqk"}> : () -> ()
    %cst_7 = arith.constant dense<0.000000e+00> : vector<2x16x16xf32>
    %13 = tpu.matmul %8, %10, %cst_7 {dimension_numbers = #tpu.dot_dimension_numbers<[2], [2], [1], [1], [0, 0, 0, 1, 1, 1], [0], [0]>} : vector<2x16x8xf32>, vector<2x16x8xf32>, vector<2x16x16xf32> -> vector<2x16x16xf32>
    "tpu.trace_stop"() : () -> ()
    %cst_8 = arith.constant dense<0xFF800000> : vector<2x16xf32>
    %14 = vector.multi_reduction <maximumf>, %13, %cst_8 [2] : vector<2x16x16xf32> to vector<2x16xf32>
    %15 = vector.shape_cast %14 : vector<2x16xf32> to vector<2x16x1xf32>
    %16 = vector.broadcast %15 : vector<2x16x1xf32> to vector<2x16x16xf32>
    %17 = arith.subf %13, %16 : vector<2x16x16xf32>
    %18 = math.exp %17 : vector<2x16x16xf32>
    %cst_9 = arith.constant dense<0.000000e+00> : vector<2x16xf32>
    %19 = vector.multi_reduction <add>, %18, %cst_9 [2] : vector<2x16x16xf32> to vector<2x16xf32>
    %20 = vector.shape_cast %19 : vector<2x16xf32> to vector<2x16x1xf32>
    %21 = vector.broadcast %20 : vector<2x16x1xf32> to vector<2x16x16xf32>
    %22 = arith.divf %18, %21 : vector<2x16x16xf32>
    "tpu.trace_start"() <{level = 10 : i32, message = "bqk,bkd->bqd"}> : () -> ()
    %cst_10 = arith.constant dense<0.000000e+00> : vector<2x16x8xf32>
    %23 = tpu.matmul %22, %12, %cst_10 {dimension_numbers = #tpu.dot_dimension_numbers<[2], [1], [1], [2], [0, 0, 0, 1, 1, 2], [0], [0]>} : vector<2x16x16xf32>, vector<2x16x8xf32>, vector<2x16x8xf32> -> vector<2x16x8xf32>
    "tpu.trace_stop"() : () -> ()
    %24 = vector.shape_cast %23 : vector<2x16x8xf32> to vector<32x8xf32>
    %25 = vector.extract_strided_slice %3 {offsets = [0, 0], sizes = [8, 32], strides = [1, 1]} : vector<32x32xf32> to vector<8x32xf32>
    %cst_11 = arith.constant dense<0.000000e+00> : vector<32x32xf32>
    %26 = tpu.matmul %24, %25, %cst_11 {dimension_numbers = #tpu.dot_dimension_numbers<[1], [0], [0], [1], [0, 0, 1, 1], [], []>} : vector<32x8xf32>, vector<8x32xf32>, vector<32x32xf32> -> vector<32x32xf32>
    %27 = arith.addf %6, %26 : vector<32x32xf32>
    %28 = vector.extract_strided_slice %2 {offsets = [0, 8], sizes = [32, 8], strides = [1, 1]} : vector<32x96xf32> to vector<32x8xf32>
    %29 = vector.shape_cast %28 : vector<32x8xf32> to vector<2x16x8xf32>
    %30 = vector.extract_strided_slice %2 {offsets = [0, 40], sizes = [32, 8], strides = [1, 1]} : vector<32x96xf32> to vector<32x8xf32>
    %31 = vector.shape_cast %30 : vector<32x8xf32> to vector<2x16x8xf32>
    %32 = vector.extract_strided_slice %2 {offsets = [0, 72], sizes = [32, 8], strides = [1, 1]} : vector<32x96xf32> to vector<32x8xf32>
    %33 = vector.shape_cast %32 : vector<32x8xf32> to vector<2x16x8xf32>
    "tpu.trace_start"() <{level = 10 : i32, message = "bqd,bkd->bqk"}> : () -> ()
    %cst_12 = arith.constant dense<0.000000e+00> : vector<2x16x16xf32>
    %34 = tpu.matmul %29, %31, %cst_12 {dimension_numbers = #tpu.dot_dimension_numbers<[2], [2], [1], [1], [0, 0, 0, 1, 1, 1], [0], [0]>} : vector<2x16x8xf32>, vector<2x16x8xf32>, vector<2x16x16xf32> -> vector<2x16x16xf32>
    "tpu.trace_stop"() : () -> ()
    %cst_13 = arith.constant dense<0xFF800000> : vector<2x16xf32>
    %35 = vector.multi_reduction <maximumf>, %34, %cst_13 [2] : vector<2x16x16xf32> to vector<2x16xf32>
    %36 = vector.shape_cast %35 : vector<2x16xf32> to vector<2x16x1xf32>
    %37 = vector.broadcast %36 : vector<2x16x1xf32> to vector<2x16x16xf32>
    %38 = arith.subf %34, %37 : vector<2x16x16xf32>
    %39 = math.exp %38 : vector<2x16x16xf32>
    %cst_14 = arith.constant dense<0.000000e+00> : vector<2x16xf32>
    %40 = vector.multi_reduction <add>, %39, %cst_14 [2] : vector<2x16x16xf32> to vector<2x16xf32>
    %41 = vector.shape_cast %40 : vector<2x16xf32> to vector<2x16x1xf32>
    %42 = vector.broadcast %41 : vector<2x16x1xf32> to vector<2x16x16xf32>
    %43 = arith.divf %39, %42 : vector<2x16x16xf32>
    "tpu.trace_start"() <{level = 10 : i32, message = "bqk,bkd->bqd"}> : () -> ()
    %cst_15 = arith.constant dense<0.000000e+00> : vector<2x16x8xf32>
    %44 = tpu.matmul %43, %33, %cst_15 {dimension_numbers = #tpu.dot_dimension_numbers<[2], [1], [1], [2], [0, 0, 0, 1, 1, 2], [0], [0]>} : vector<2x16x16xf32>, vector<2x16x8xf32>, vector<2x16x8xf32> -> vector<2x16x8xf32>
    "tpu.trace_stop"() : () -> ()
    %45 = vector.shape_cast %44 : vector<2x16x8xf32> to vector<32x8xf32>
    %46 = vector.extract_strided_slice %3 {offsets = [8, 0], sizes = [8, 32], strides = [1, 1]} : vector<32x32xf32> to vector<8x32xf32>
    %cst_16 = arith.constant dense<0.000000e+00> : vector<32x32xf32>
    %47 = tpu.matmul %45, %46, %cst_16 {dimension_numbers = #tpu.dot_dimension_numbers<[1], [0], [0], [1], [0, 0, 1, 1], [], []>} : vector<32x8xf32>, vector<8x32xf32>, vector<32x32xf32> -> vector<32x32xf32>
    %48 = arith.addf %27, %47 : vector<32x32xf32>
    %49 = vector.extract_strided_slice %2 {offsets = [0, 16], sizes = [32, 8], strides = [1, 1]} : vector<32x96xf32> to vector<32x8xf32>
    %50 = vector.shape_cast %49 : vector<32x8xf32> to vector<2x16x8xf32>
    %51 = vector.extract_strided_slice %2 {offsets = [0, 48], sizes = [32, 8], strides = [1, 1]} : vector<32x96xf32> to vector<32x8xf32>
    %52 = vector.shape_cast %51 : vector<32x8xf32> to vector<2x16x8xf32>
    %53 = vector.extract_strided_slice %2 {offsets = [0, 80], sizes = [32, 8], strides = [1, 1]} : vector<32x96xf32> to vector<32x8xf32>
    %54 = vector.shape_cast %53 : vector<32x8xf32> to vector<2x16x8xf32>
    "tpu.trace_start"() <{level = 10 : i32, message = "bqd,bkd->bqk"}> : () -> ()
    %cst_17 = arith.constant dense<0.000000e+00> : vector<2x16x16xf32>
    %55 = tpu.matmul %50, %52, %cst_17 {dimension_numbers = #tpu.dot_dimension_numbers<[2], [2], [1], [1], [0, 0, 0, 1, 1, 1], [0], [0]>} : vector<2x16x8xf32>, vector<2x16x8xf32>, vector<2x16x16xf32> -> vector<2x16x16xf32>
    "tpu.trace_stop"() : () -> ()
    %cst_18 = arith.constant dense<0xFF800000> : vector<2x16xf32>
    %56 = vector.multi_reduction <maximumf>, %55, %cst_18 [2] : vector<2x16x16xf32> to vector<2x16xf32>
    %57 = vector.shape_cast %56 : vector<2x16xf32> to vector<2x16x1xf32>
    %58 = vector.broadcast %57 : vector<2x16x1xf32> to vector<2x16x16xf32>
    %59 = arith.subf %55, %58 : vector<2x16x16xf32>
    %60 = math.exp %59 : vector<2x16x16xf32>
    %cst_19 = arith.constant dense<0.000000e+00> : vector<2x16xf32>
    %61 = vector.multi_reduction <add>, %60, %cst_19 [2] : vector<2x16x16xf32> to vector<2x16xf32>
    %62 = vector.shape_cast %61 : vector<2x16xf32> to vector<2x16x1xf32>
    %63 = vector.broadcast %62 : vector<2x16x1xf32> to vector<2x16x16xf32>
    %64 = arith.divf %60, %63 : vector<2x16x16xf32>
    "tpu.trace_start"() <{level = 10 : i32, message = "bqk,bkd->bqd"}> : () -> ()
    %cst_20 = arith.constant dense<0.000000e+00> : vector<2x16x8xf32>
    %65 = tpu.matmul %64, %54, %cst_20 {dimension_numbers = #tpu.dot_dimension_numbers<[2], [1], [1], [2], [0, 0, 0, 1, 1, 2], [0], [0]>} : vector<2x16x16xf32>, vector<2x16x8xf32>, vector<2x16x8xf32> -> vector<2x16x8xf32>
    "tpu.trace_stop"() : () -> ()
    %66 = vector.shape_cast %65 : vector<2x16x8xf32> to vector<32x8xf32>
    %67 = vector.extract_strided_slice %3 {offsets = [16, 0], sizes = [8, 32], strides = [1, 1]} : vector<32x32xf32> to vector<8x32xf32>
    %cst_21 = arith.constant dense<0.000000e+00> : vector<32x32xf32>
    %68 = tpu.matmul %66, %67, %cst_21 {dimension_numbers = #tpu.dot_dimension_numbers<[1], [0], [0], [1], [0, 0, 1, 1], [], []>} : vector<32x8xf32>, vector<8x32xf32>, vector<32x32xf32> -> vector<32x32xf32>
    %69 = arith.addf %48, %68 : vector<32x32xf32>
    %70 = vector.extract_strided_slice %2 {offsets = [0, 24], sizes = [32, 8], strides = [1, 1]} : vector<32x96xf32> to vector<32x8xf32>
    %71 = vector.shape_cast %70 : vector<32x8xf32> to vector<2x16x8xf32>
    %72 = vector.extract_strided_slice %2 {offsets = [0, 56], sizes = [32, 8], strides = [1, 1]} : vector<32x96xf32> to vector<32x8xf32>
    %73 = vector.shape_cast %72 : vector<32x8xf32> to vector<2x16x8xf32>
    %74 = vector.extract_strided_slice %2 {offsets = [0, 88], sizes = [32, 8], strides = [1, 1]} : vector<32x96xf32> to vector<32x8xf32>
    %75 = vector.shape_cast %74 : vector<32x8xf32> to vector<2x16x8xf32>
    "tpu.trace_start"() <{level = 10 : i32, message = "bqd,bkd->bqk"}> : () -> ()
    %cst_22 = arith.constant dense<0.000000e+00> : vector<2x16x16xf32>
    %76 = tpu.matmul %71, %73, %cst_22 {dimension_numbers = #tpu.dot_dimension_numbers<[2], [2], [1], [1], [0, 0, 0, 1, 1, 1], [0], [0]>} : vector<2x16x8xf32>, vector<2x16x8xf32>, vector<2x16x16xf32> -> vector<2x16x16xf32>
    "tpu.trace_stop"() : () -> ()
    %cst_23 = arith.constant dense<0xFF800000> : vector<2x16xf32>
    %77 = vector.multi_reduction <maximumf>, %76, %cst_23 [2] : vector<2x16x16xf32> to vector<2x16xf32>
    %78 = vector.shape_cast %77 : vector<2x16xf32> to vector<2x16x1xf32>
    %79 = vector.broadcast %78 : vector<2x16x1xf32> to vector<2x16x16xf32>
    %80 = arith.subf %76, %79 : vector<2x16x16xf32>
    %81 = math.exp %80 : vector<2x16x16xf32>
    %cst_24 = arith.constant dense<0.000000e+00> : vector<2x16xf32>
    %82 = vector.multi_reduction <add>, %81, %cst_24 [2] : vector<2x16x16xf32> to vector<2x16xf32>
    %83 = vector.shape_cast %82 : vector<2x16xf32> to vector<2x16x1xf32>
    %84 = vector.broadcast %83 : vector<2x16x1xf32> to vector<2x16x16xf32>
    %85 = arith.divf %81, %84 : vector<2x16x16xf32>
    "tpu.trace_start"() <{level = 10 : i32, message = "bqk,bkd->bqd"}> : () -> ()
    %cst_25 = arith.constant dense<0.000000e+00> : vector<2x16x8xf32>
    %86 = tpu.matmul %85, %75, %cst_25 {dimension_numbers = #tpu.dot_dimension_numbers<[2], [1], [1], [2], [0, 0, 0, 1, 1, 2], [0], [0]>} : vector<2x16x16xf32>, vector<2x16x8xf32>, vector<2x16x8xf32> -> vector<2x16x8xf32>
    "tpu.trace_stop"() : () -> ()
    %87 = vector.shape_cast %86 : vector<2x16x8xf32> to vector<32x8xf32>
    %88 = vector.extract_strided_slice %3 {offsets = [24, 0], sizes = [8, 32], strides = [1, 1]} : vector<32x32xf32> to vector<8x32xf32>
    %cst_26 = arith.constant dense<0.000000e+00> : vector<32x32xf32>
    %89 = tpu.matmul %87, %88, %cst_26 {dimension_numbers = #tpu.dot_dimension_numbers<[1], [0], [0], [1], [0, 0, 1, 1], [], []>} : vector<32x8xf32>, vector<8x32xf32>, vector<32x32xf32> -> vector<32x32xf32>
    %90 = arith.addf %69, %89 : vector<32x32xf32>
    %c0_27 = arith.constant 0 : index
    %c0_28 = arith.constant 0 : index
    %91 = vector.load %arg5[%c0_27, %c0_28] : memref<32x32xf32, #tpu.memory_space<vmem>>, vector<32x32xf32>
    tpu.vector_store %arg5[%c0_27, %c0_28], %90 {strides = array<i32>} : memref<32x32xf32, #tpu.memory_space<vmem>>, vector<32x32xf32>,
    return
  }
  func.func @transform_0(%arg0: i32) -> (i32, i32) {
    %c0_i32 = arith.constant 0 : i32
    %c0_i32_0 = arith.constant 0 : i32
    return %arg0, %c0_i32 : i32, i32
  }
  func.func @transform_1(%arg0: i32) -> (i32, i32) {
    %c0_i32 = arith.constant 0 : i32
    %c0_i32_0 = arith.constant 0 : i32
    %c0_i32_1 = arith.constant 0 : i32
    return %c0_i32, %c0_i32_0 : i32, i32
  }
  func.func @transform_2(%arg0: i32) -> (i32, i32) {
    %c0_i32 = arith.constant 0 : i32
    %c0_i32_0 = arith.constant 0 : i32
    %c0_i32_1 = arith.constant 0 : i32
    return %c0_i32, %c0_i32_0 : i32, i32
  }
  func.func @transform_3(%arg0: i32) -> (i32, i32) {
    %c0_i32 = arith.constant 0 : i32
    %c0_i32_0 = arith.constant 0 : i32
    %c0_i32_1 = arith.constant 0 : i32
    return %c0_i32, %c0_i32_0 : i32, i32
  }
  func.func @transform_4(%arg0: i32) -> (i32, i32) {
    %c0_i32 = arith.constant 0 : i32
    %c0_i32_0 = arith.constant 0 : i32
    return %arg0, %c0_i32 : i32, i32
  }
}

</mosaic_0001>

<bundles_post_ra>
// kernel: tpu_custom_call.1
= control target key start
LH: loop header
LB: loop body
LE: loop exit
PB: predicated region body
PF: predicated region fallthrough
CT: control target
= control target key end

     0   :  { %s3025_s15 = smov 0   ;;  %s3272_s0 = inlined_call_operand.vmem [shape: f32[64,32], index: 0, kind: input, shape index: {}]   ;;  %s3273_s1 = inlined_call_operand.vmem [shape: f32[32,96], index: 1, kind: input, shape index: {}]   ;;  %s3274_s2 = inlined_call_operand.vmem [shape: f32[32,32], index: 2, kind: input, shape index: {}]   ;;  %s3275_s3 = inlined_call_operand.vmem [shape: f32[1,32], index: 3, kind: input, shape index: {}]   ;;  %s3276_s4 = inlined_call_operand.vmem [shape: f32[64,32], index: 4, kind: output, shape index: {}]  }
   0x1 LB: > { %s2384_s16 = sadd.s32 4294967295, %s2987_s15   ;;  %p2388_p0 = scmp.ge.s32.totalorder %s2987_s15, 1  ;;  %s2987_s15 = sphi %s3025_s15, %s14_s15  }
   0x2   : > { %p163_p1 = scmp.lt.s32.totalorder %s2987_s15, 3 }
   0x4   : > { %p164_p2 = pnand %p2388_p0, %p163_p1 }
   0x5   : > { %v205_v0 = vld [vmem:[%s3273_s1] sm:$0xff] (!%p164_p2)  ;;  %v206_v1 = vld [vmem:[%s3273_s1 + $0x8] sm:$0xff] (!%p164_p2)  ;;  %v207_v2 = vld [vmem:[%s3273_s1 + $0x10] sm:$0xff] (!%p164_p2)  ;;  %s2389_s23 = sshll.u32 (!%p164_p2), %s2384_s16, 2  ;;  %vm209_vm0 = vcmask (!%p164_p2), 261120   ;;  %vm328_vm1 = vcmask (!%p164_p2), 64512  }
   0x6   : > { %167 = sbr.rel (%p164_p2) target bundleno = 3583 (0xdff), region = 36  ;;  %v2714_v3 = vpack.c.bf16 (!%p164_p2), %v206_v1, %v205_v0  ;;  %v208_v4 = vld [vmem:[%s3273_s1 + $0x18] sm:$0xff] (!%p164_p2)  ;;  %p190_p3 = scmp.lt.s32.totalorder (!%p164_p2), %s2389_s23, 7  ;;  %vm3093_vm2 = vmpackc.low (!%p164_p2), %vm328_vm1, %vm328_vm1  ;;  %vm501_vm3 = vcmask (!%p164_p2), 130048   ;;  %v307_v53 = vld [vmem:[%s3274_s2] sm:$0xff] (!%p164_p2) }
   0x7   : > { %v2718_v5 = vpack.c.bf16 (!%p164_p2), %v208_v4, %v207_v2  ;;  %s2989_s30 = smov (!%p164_p2), 96   ;;  %s2990_s5 = smov (!%p164_p2), 64  }
   0x8   : > { %2715 = vmatprep.subr.bf16.mxu1 (!%p164_p2), %v2714_v3  ;;  %s2991_s6 = smov (!%p164_p2), 120   ;;  %s2992_s7 = smov (!%p164_p2), 88  }
   0x9   : > { %2717 = vmatpush3.bf16.msra.mxu1 (!%p164_p2), %v2714_v3  ;;  %s2993_s10 = smov (!%p164_p2), 56   ;;  %s2994_s11 = smov (!%p164_p2), 80  }
   0xa   : > { %2719 = vmatprep.subr.bf16.mxu1 (!%p164_p2), %v2718_v5  ;;  %s2995_s12 = smov (!%p164_p2), 112   ;;  %s2996_s16 = smov (!%p164_p2), 48  }
   0xb   : > { %s2997_s17 = smov (!%p164_p2), 72   ;;  %s2998_s20 = smov (!%p164_p2), 104  }
   0xc   : > { %s2999_s21 = smov (!%p164_p2), 40  }
   0xd   : > { %s3280_s23 = smov (!%p190_p3, %s2389_s23), 7  ;;  %2721 = vmatpush3.bf16.msra.mxu1 %v2718_v5 }
   0xe   : > { %s2390_s26 = sshll.u32 %s3280_s23, 3 }
   0xf   : > { %s193_s29 = scalar_lea.vmem %s3272_s0, %s2390_s26 }
  0x10   : > { %v3053_v6 = vld [vmem:[%s193_s29] sm:$0xff]  ;;  %v3057_v7 = vld [vmem:[%s193_s29 + $0x8] sm:$0xff]  ;;  %v3059_v8 = vld [vmem:[%s193_s29 + $0x10] sm:$0xff] }
  0x11   : > { %2564 = vmatprep.mubr.msk.f32.mxu1 %vm209_vm0, %v3053_v6  ;;  %v3065_v9 = vld [vmem:[%s193_s29 + $0x18] sm:$0xff] }
  0x12   : > { %2565 = vmatmul.mubr.msk.f32.vlgmr.msra.gmra.mrb[0].mxu1 %vm209_vm0, %v3057_v7 }
  0x13   : > { %2567 = vmatprep.mubr.msk.f32.mxu1 %vm209_vm0, %v3059_v8 }
  0x16   : > { %2568 = vmatmul.mubr.msk.f32.gmra.mrb[2].mxu1 %vm209_vm0, %v3065_v9 }
  0xe5   : > { %v3069_v10 = vpop.f32.mrb[0].mxu1 }
  0xe6   : > { %v3071_v11 = vpop.f32.mrb[1].mxu1 }
  0xe7   : > { %2574 = vmatprep.mubr.msk.f32.mxu1 %vm328_vm1, %v3071_v11  ;;  %v3077_v12 = vpack.i.bf16 %v3069_v10, %v3071_v11 }
  0xe9   : > { %2838 = vrot.lane.b32.xlu0 %v3077_v12, %s2989_s30  ;;  %v3080_v13 = vpop.f32.mrb[2].mxu1 }
  0xea   : > { %v3082_v14 = vpop.f32.mrb[3].mxu1 }
  0xeb   : > { %v3086_v15 = vpack.i.bf16 %v3080_v13, %v3082_v14  ;;  %2581 = vmatprep.mubr.msk.f32.mxu0 %vm328_vm1, %v3082_v14 }
  0xed   : > { %2843 = vrot.lane.b32.xlu0 %v3086_v15, %s2989_s30  ;;  %s199_s30 = scalar_lea.vmem %s3276_s4, %s2390_s26 }
 0x15b   : > { %v2839_v16 = vpop.permute.xlu0 %2838 }
 0x15c   : > { %v2841_v17 = vunpack.i.h.bf16 %v2839_v16  ;;  %v2840_v18 = vunpack.i.l.bf16 %v2839_v16 }
 0x15e   : > { %v2722_v20 = vpack.c.bf16 %v2841_v17, %v2840_v18 }
 0x15f   : > { %v2844_v21 = vpop.permute.xlu0 %2843 }
 0x160   : > { %v2846_v22 = vunpack.i.h.bf16 %v2844_v21  ;;  %v2845_v23 = vunpack.i.l.bf16 %v2844_v21  ;;  %2724 = vmatprep.subr.msk.bf16.mxu1 %vm3093_vm2, %v2722_v20 }
 0x161   : > { %2727 = vmatpush3.bf16.xpose.msk.msra.mxu1 %vm3093_vm2, %v2722_v20 }
 0x162   : > { %v2728_v24 = vpack.c.bf16 %v2846_v22, %v2845_v23 }
 0x164   : > { %2730 = vmatprep.subr.msk.bf16.mxu0 %vm3093_vm2, %v2728_v24 }
 0x165   : > { %2733 = vmatpush3.bf16.xpose.msk.msra.mxu0 %vm3093_vm2, %v2728_v24 }
 0x166   : > { %2598 = vmatprep.subr.mxu0 %v307_v53 }
 0x168   : > { %2575 = vmatmul.mubr.msk.f32.vlgmr.msra.gmra.mrb[4].mxu1 %vm328_vm1, %v3069_v10 }
 0x16c   : > { %2582 = vmatmul.mubr.msk.f32.vlgmr.msra.gmra.mrb[0].mxu0 %vm328_vm1, %v3080_v13 }
 0x16d   : > { %2599 = vmatpush3.msra.mxu0 %v307_v53 }
 0x23b   : > { %v2576_v25 = vpop.f32.mrb[4].mxu1 }
 0x23c   : > { %v403_v26 = vpop.f32.mrb[5].mxu1  ;;  %v505_v31 = vsel %vm501_vm3, %v2576_v25, -inf }
 0x23d   : > { %v502_v27 = vsel %vm501_vm3, %v403_v26, -inf }
 0x23e   : > { %503 = vmax.xlane.f32.xlu1 %v502_v27 }
 0x23f   : > { %v2583_v28 = vpop.f32.mrb[0].mxu0 }
 0x240   : > { %v492_v29 = vpop.f32.mrb[1].mxu0  ;;  %v511_v32 = vsel %vm501_vm3, %v2583_v28, -inf }
 0x241   : > { %v508_v30 = vsel %vm501_vm3, %v492_v29, -inf }
 0x242   : > { %509 = vmax.xlane.f32.xlu0 %v508_v30  ;;  %506 = vmax.xlane.f32.xlu1 %v505_v31 }
 0x246   : > { %512 = vmax.xlane.f32.xlu1 %v511_v32 }
 0x258   : > { %2853 = vrot.lane.b32.xlu0 %v3086_v15, %s2990_s5 }
 0x25c   : > { %912 = vrot.lane.b32.xlu0 %v3082_v14, %s2991_s6 }
 0x2cb   : > { %v504_v33 = vpop.xlane.xlu1 %503 }
 0x2cc   : > { %v514_v34 = vsub.f32 %v403_v26, %v504_v33 }
 0x2ce   : > { %v518_v38 = vmul.f32 1.442695, %v514_v34 }
 0x2cf   : > { %v507_v35 = vpop.xlane.xlu1 %506  ;;  %v510_v40 = vpop.xlane.xlu0 %509 }
 0x2d0   : > { %v515_v36 = vsub.f32 %v2576_v25, %v507_v35  ;;  %v516_v42 = vsub.f32 %v492_v29, %v510_v40 }
 0x2d2   : > { %v520_v37 = vmul.f32 1.442695, %v515_v36  ;;  %v522_v44 = vmul.f32 1.442695, %v516_v42 }
 0x2d3   : > { %v513_v39 = vpop.xlane.xlu1 %512  ;;  %v2854_v58 = vpop.permute.xlu0 %2853 }
 0x2d4   : > { %v517_v41 = vsub.f32 %v2583_v28, %v513_v39  ;;  %2917 = vpow2.f32 %v520_v37  ;;  %v2856_v62 = vunpack.i.h.bf16 %v2854_v58  ;;  %v2855_v63 = vunpack.i.l.bf16 %v2854_v58 }
 0x2d5   : > { %2919 = vpow2.f32 %v518_v38 }
 0x2d6   : > { %v524_v43 = vmul.f32 1.442695, %v517_v41  ;;  %v2738_v5 = vpack.c.bf16 %v2856_v62, %v2855_v63 }
 0x2d7   : > { %v913_v35 = vpop.permute.xlu0 %912 }
 0x2d8   : > { %2921 = vpow2.f32 %v524_v43 }
 0x2d9   : > { %2923 = vpow2.f32 %v522_v44 }
 0x2de   : > { %v2918_v45 = vpop.eup %2917 }
 0x2df   : > { %v529_v46 = vsel %vm501_vm3, %v2918_v45, 0.0  ;;  %v2920_v47 = vpop.eup %2919 }
 0x2e0   : > { %530 = vadd.xlane.f32.xlu1 %v529_v46  ;;  %v526_v48 = vsel %vm501_vm3, %v2920_v47, 0.0 }
 0x2e2   : > { %v2922_v49 = vpop.eup %2921 }
 0x2e3   : > { %v535_v50 = vsel %vm501_vm3, %v2922_v49, 0.0  ;;  %v2924_v51 = vpop.eup %2923 }
 0x2e4   : > { %527 = vadd.xlane.f32.xlu1 %v526_v48  ;;  %v532_v52 = vsel %vm501_vm3, %v2924_v51, 0.0 }
 0x2e8   : > { %536 = vadd.xlane.f32.xlu1 %v535_v50 }
 0x2ec   : > { %533 = vadd.xlane.f32.xlu1 %v532_v52 }
 0x2fd   : > { %2848 = vrot.lane.b32.xlu1 %v3077_v12, %s2990_s5 }
 0x301   : > { %2858 = vrot.lane.b32.xlu1 %v3077_v12, %s2992_s7 }
 0x305   : > { %2863 = vrot.lane.b32.xlu1 %v3086_v15, %s2992_s7 }
 0x309   : > { %821 = vrot.lane.b32.xlu1 %v3071_v11, %s2991_s6 }
 0x30d   : > { %823 = vrot.lane.b32.xlu1 %v3069_v10, %s2991_s6 }
 0x311   : > { %914 = vrot.lane.b32.xlu1 %v3080_v13, %s2991_s6 }
 0x36d   : > { %v531_v54 = vpop.xlane.xlu1 %530 }
 0x371   : > { %v528_v55 = vpop.xlane.xlu1 %527 }
 0x372   : > { %2925 = vrcp.f32 %v528_v55 }
 0x373   : > { %2927 = vrcp.f32 %v531_v54 }
 0x375   : > { %v537_v56 = vpop.xlane.xlu1 %536 }
 0x379   : > { %v534_v57 = vpop.xlane.xlu1 %533 }
 0x37a   : > { %2929 = vrcp.f32 %v534_v57 }
 0x37b   : > { %2931 = vrcp.f32 %v537_v56 }
 0x37c   : > { %v2926_v59 = vpop.eup %2925 }
 0x37d   : > { %v2849_v60 = vpop.permute.xlu1 %2848  ;;  %v539_v61 = vmul.f32 %v2926_v59, %v2920_v47  ;;  %v2928_v3 = vpop.eup %2927 }
 0x37e   : > { %v2851_v0 = vunpack.i.h.bf16 %v2849_v60  ;;  %v2850_v1 = vunpack.i.l.bf16 %v2849_v60  ;;  %v541_v20 = vmul.f32 %v2928_v3, %v2918_v45 }
 0x37f   : > { %2588 = vmatprep.mubr.msk.f32.mxu1 %vm501_vm3, %v539_v61 }
 0x380   : > { %v2734_v2 = vpack.c.bf16 %v2851_v0, %v2850_v1 }
 0x381   : > { %v2859_v4 = vpop.permute.xlu1 %2858 }
 0x382   : > { %v2861_v16 = vunpack.i.h.bf16 %v2859_v4  ;;  %v2860_v17 = vunpack.i.l.bf16 %v2859_v4  ;;  %2735 = vmatprep.subr.bf16.mxu1 %v2734_v2 }
 0x383   : > { %2737 = vmatpush3.bf16.msra.mxu1 %v2734_v2 }
 0x384   : > { %v2930_v18 = vpop.eup %2929  ;;  %2739 = vmatprep.subr.bf16.mxu1 %v2738_v5  ;;  %v2742_v24 = vpack.c.bf16 %v2861_v16, %v2860_v17 }
 0x385   : > { %v2932_v21 = vpop.eup %2931  ;;  %v2864_v22 = vpop.permute.xlu1 %2863  ;;  %v543_v23 = vmul.f32 %v2930_v18, %v2924_v51 }
 0x386   : > { %v2866_v25 = vunpack.i.h.bf16 %v2864_v22  ;;  %v2865_v26 = vunpack.i.l.bf16 %v2864_v22  ;;  %2589 = vmatmul.mubr.msk.f32.vlgmr.msra.gmra.mrb[6].mxu1 %vm501_vm3, %v541_v20  ;;  %v545_v27 = vmul.f32 %v2932_v21, %v2922_v49 }
 0x387   : > { %2741 = vmatpush3.bf16.msra.mxu1 %v2738_v5  ;;  %2595 = vmatprep.mubr.msk.f32.mxu1 %vm501_vm3, %v543_v23 }
 0x388   : > { %v2748_v28 = vpack.c.bf16 %v2866_v25, %v2865_v26  ;;  %2744 = vmatprep.subr.msk.bf16.mxu1 %vm3093_vm2, %v2742_v24 }
 0x389   : > { %v822_v29 = vpop.permute.xlu1 %821 }
 0x38a   : > { %2596 = vmatmul.mubr.msk.f32.vlgmr.msra.gmra.mrb[8].mxu1 %vm501_vm3, %v545_v27  ;;  %2750 = vmatprep.subr.msk.bf16.mxu0 %vm3093_vm2, %v2748_v28 }
 0x38b   : > { %2610 = vmatprep.mubr.msk.f32.mxu1 %vm328_vm1, %v822_v29 }
 0x38d   : > { %v824_v30 = vpop.permute.xlu1 %823 }
 0x390   : > { %2747 = vmatpush3.bf16.xpose.msk.msra.mxu1 %vm3093_vm2, %v2742_v24 }
 0x391   : > { %v915_v36 = vpop.permute.xlu1 %914 }
 0x397   : > { %2611 = vmatmul.mubr.msk.f32.vlgmr.msra.gmra.mrb[10].mxu1 %vm328_vm1, %v824_v30 }
 0x459   : > { %v2590_v31 = vpop.f32.mrb[6].mxu1 }
 0x45a   : > { %v624_v32 = vpop.f32.mrb[7].mxu1 }
 0x45b   : > { %2600 = vmatprep.mubr.msk.f32.mxu0 %vm328_vm1, %v624_v32 }
 0x45c   : > { %2601 = vmatmul.mubr.msk.f32.vlgmr.msra.gmra.mrb[2].mxu0 %vm328_vm1, %v2590_v31 }
 0x45d   : > { %2753 = vmatpush3.bf16.xpose.msk.msra.mxu0 %vm3093_vm2, %v2748_v28  ;;  %v2597_v33 = vpop.f32.mrb[8].mxu1 }
 0x45e   : > { %v711_v34 = vpop.f32.mrb[9].mxu1 }
 0x45f   : > { %2603 = vmatprep.mubr.msk.f32.mxu0 %vm328_vm1, %v711_v34 }
 0x460   : > { %2604 = vmatmul.mubr.msk.f32.gmra.mrb[4].mxu0 %vm328_vm1, %v2597_v33 }
 0x461   : > { %2617 = vmatprep.mubr.msk.f32.mxu0 %vm328_vm1, %v913_v35 }
 0x464   : > { %2618 = vmatmul.mubr.msk.f32.vlgmr.msra.gmra.mrb[6].mxu0 %vm328_vm1, %v915_v36  ;;  %v308_v36 = vld [vmem:[%s3274_s2 + $0x8] sm:$0xff] }
 0x46a   : > { %v2612_v37 = vpop.f32.mrb[10].mxu1 }
 0x46b   : > { %v903_v38 = vpop.f32.mrb[11].mxu1  ;;  %v1006_v39 = vsel %vm501_vm3, %v2612_v37, -inf }
 0x46c   : > { %1007 = vmax.xlane.f32.xlu1 %v1006_v39  ;;  %v1003_v40 = vsel %vm501_vm3, %v903_v38, -inf }
 0x46d   : > { %1004 = vmax.xlane.f32.xlu0 %v1003_v40 }
 0x4f9   : > { %v1008_v46 = vpop.xlane.xlu1 %1007 }
 0x4fa   : > { %v1005_v41 = vpop.xlane.xlu0 %1004  ;;  %v1016_v47 = vsub.f32 %v2612_v37, %v1008_v46 }
 0x4fb   : > { %v1015_v42 = vsub.f32 %v903_v38, %v1005_v41 }
 0x4fc   : > { %v1021_v48 = vmul.f32 1.442695, %v1016_v47 }
 0x4fd   : > { %v1019_v43 = vmul.f32 1.442695, %v1015_v42 }
 0x4ff   : > { %2933 = vpow2.f32 %v1019_v43 }
 0x500   : > { %2935 = vpow2.f32 %v1021_v48 }
 0x509   : > { %v2934_v44 = vpop.eup %2933 }
 0x50a   : > { %v1027_v45 = vsel %vm501_vm3, %v2934_v44, 0.0  ;;  %v2936_v53 = vpop.eup %2935 }
 0x50b   : > { %1028 = vadd.xlane.f32.xlu1 %v1027_v45  ;;  %v1030_v54 = vsel %vm501_vm3, %v2936_v53, 0.0 }
 0x537   : > { %v2619_v49 = vpop.f32.mrb[6].mxu0 }
 0x538   : > { %v994_v50 = vpop.f32.mrb[7].mxu0  ;;  %v1012_v52 = vsel %vm501_vm3, %v2619_v49, -inf }
 0x539   : > { %v1009_v51 = vsel %vm501_vm3, %v994_v50, -inf }
 0x53a   : > { %1010 = vmax.xlane.f32.xlu0 %v1009_v51 }
 0x53e   : > { %1013 = vmax.xlane.f32.xlu0 %v1012_v52 }
 0x542   : > { %1031 = vadd.xlane.f32.xlu0 %v1030_v54 }
 0x598   : > { %v1029_v55 = vpop.xlane.xlu1 %1028 }
 0x599   : > { %2937 = vrcp.f32 %v1029_v55 }
 0x5a3   : > { %v2938_v56 = vpop.eup %2937 }
 0x5a4   : > { %v1040_v57 = vmul.f32 %v2938_v56, %v2934_v44 }
 0x5a6   : > { %2624 = vmatprep.mubr.msk.f32.mxu1 %vm501_vm3, %v1040_v57 }
 0x5c7   : > { %v1011_v58 = vpop.xlane.xlu0 %1010 }
 0x5c8   : > { %v1017_v59 = vsub.f32 %v994_v50, %v1011_v58 }
 0x5ca   : > { %v1023_v60 = vmul.f32 1.442695, %v1017_v59 }
 0x5cb   : > { %v1014_v61 = vpop.xlane.xlu0 %1013 }
 0x5cc   : > { %2939 = vpow2.f32 %v1023_v60  ;;  %v1018_v62 = vsub.f32 %v2619_v49, %v1014_v61 }
 0x5ce   : > { %v1025_v63 = vmul.f32 1.442695, %v1018_v62 }
 0x5cf   : > { %v1032_v4 = vpop.xlane.xlu0 %1031 }
 0x5d0   : > { %2941 = vpow2.f32 %v1025_v63 }
 0x5d1   : > { %2943 = vrcp.f32 %v1032_v4 }
 0x5d6   : > { %v2940_v0 = vpop.eup %2939 }
 0x5d7   : > { %v1033_v1 = vsel %vm501_vm3, %v2940_v0, 0.0 }
 0x5d8   : > { %1034 = vadd.xlane.f32.xlu1 %v1033_v1 }
 0x5da   : > { %v2942_v2 = vpop.eup %2941 }
 0x5db   : > { %v1036_v3 = vsel %vm501_vm3, %v2942_v2, 0.0  ;;  %v2944_v22 = vpop.eup %2943 }
 0x5dc   : > { %1037 = vadd.xlane.f32.xlu0 %v1036_v3  ;;  %v1042_v30 = vmul.f32 %v2944_v22, %v2936_v53 }
 0x5e9   : > { %2868 = vrot.lane.b32.xlu1 %v3077_v12, %s2993_s10 }
 0x5ed   : > { %2878 = vrot.lane.b32.xlu1 %v3077_v12, %s2994_s11 }
 0x5f1   : > { %2883 = vrot.lane.b32.xlu1 %v3086_v15, %s2994_s11 }
 0x5f2   : > { %2873 = vrot.lane.b32.xlu0 %v3086_v15, %s2993_s10 }
 0x5f5   : > { %1324 = vrot.lane.b32.xlu1 %v3069_v10, %s2995_s12 }
 0x5f6   : > { %1322 = vrot.lane.b32.xlu0 %v3071_v11, %s2995_s12 }
 0x5f9   : > { %1415 = vrot.lane.b32.xlu1 %v3080_v13, %s2995_s12 }
 0x5fa   : > { %1413 = vrot.lane.b32.xlu0 %v3082_v14, %s2995_s12 }
 0x665   : > { %v1035_v5 = vpop.xlane.xlu1 %1034 }
 0x666   : > { %2945 = vrcp.f32 %v1035_v5 }
 0x669   : > { %v2869_v16 = vpop.permute.xlu1 %2868  ;;  %v1038_v17 = vpop.xlane.xlu0 %1037 }
 0x66a   : > { %v2871_v18 = vunpack.i.h.bf16 %v2869_v16  ;;  %v2870_v20 = vunpack.i.l.bf16 %v2869_v16  ;;  %2947 = vrcp.f32 %v1038_v17 }
 0x66c   : > { %v2754_v21 = vpack.c.bf16 %v2871_v18, %v2870_v20 }
 0x66d   : > { %v2879_v23 = vpop.permute.xlu1 %2878  ;;  %v2874_v24 = vpop.permute.xlu0 %2873 }
 0x66e   : > { %v2881_v25 = vunpack.i.h.bf16 %v2879_v23  ;;  %v2880_v26 = vunpack.i.l.bf16 %v2879_v23  ;;  %v2876_v27 = vunpack.i.h.bf16 %v2874_v24  ;;  %v2875_v28 = vunpack.i.l.bf16 %v2874_v24  ;;  %2755 = vmatprep.subr.bf16.mxu1 %v2754_v21 }
 0x66f   : > { %2757 = vmatpush3.bf16.msra.mxu1 %v2754_v21 }
 0x670   : > { %v2946_v29 = vpop.eup %2945  ;;  %v2762_v31 = vpack.c.bf16 %v2881_v25, %v2880_v26  ;;  %v2758_v32 = vpack.c.bf16 %v2876_v27, %v2875_v28  ;;  %v309_v27 = vld [vmem:[%s3274_s2 + $0x10] sm:$0xff] }
 0x671   : > { %v2884_v33 = vpop.permute.xlu1 %2883  ;;  %v1323_v34 = vpop.permute.xlu0 %1322  ;;  %v1044_v35 = vmul.f32 %v2946_v29, %v2940_v0 }
 0x672   : > { %2625 = vmatmul.mubr.msk.f32.vlgmr.msra.gmra.mrb[12].mxu1 %vm501_vm3, %v1042_v30  ;;  %2759 = vmatprep.subr.bf16.mxu0 %v2758_v32  ;;  %v2886_v37 = vunpack.i.h.bf16 %v2884_v33  ;;  %v2885_v38 = vunpack.i.l.bf16 %v2884_v33 }
 0x673   : > { %2764 = vmatprep.subr.msk.bf16.mxu1 %vm3093_vm2, %v2762_v31  ;;  %2761 = vmatpush3.bf16.msra.mxu0 %v2758_v32 }
 0x674   : > { %v2948_v39 = vpop.eup %2947  ;;  %2631 = vmatprep.mubr.msk.f32.mxu0 %vm501_vm3, %v1044_v35  ;;  %2646 = vmatprep.mubr.msk.f32.mxu1 %vm328_vm1, %v1323_v34  ;;  %v2768_v41 = vpack.c.bf16 %v2886_v37, %v2885_v38 }
 0x675   : > { %v1046_v40 = vmul.f32 %v2948_v39, %v2942_v2  ;;  %2634 = vmatprep.subr.mxu0 %v308_v36  ;;  %v1325_v42 = vpop.permute.xlu1 %1324  ;;  %v1414_v47 = vpop.permute.xlu0 %1413 }
 0x677   : > { %2632 = vmatmul.mubr.msk.f32.vlgmr.msra.gmra.mrb[8].mxu0 %vm501_vm3, %v1046_v40 }
 0x678   : > { %2635 = vmatpush3.msra.mxu0 %v308_v36  ;;  %2767 = vmatpush3.bf16.xpose.msk.msra.mxu1 %vm3093_vm2, %v2762_v31 }
 0x679   : > { %2770 = vmatprep.subr.msk.bf16.mxu0 %vm3093_vm2, %v2768_v41  ;;  %v1416_v48 = vpop.permute.xlu1 %1415 }
 0x67f   : > { %2647 = vmatmul.mubr.msk.f32.vlgmr.msra.gmra.mrb[14].mxu1 %vm328_vm1, %v1325_v42 }
 0x745   : > { %v2626_v43 = vpop.f32.mrb[12].mxu1 }
 0x746   : > { %v1125_v44 = vpop.f32.mrb[13].mxu1 }
 0x747   : > { %2636 = vmatprep.mubr.msk.f32.mxu0 %vm328_vm1, %v1125_v44 }
 0x748   : > { %2637 = vmatmul.mubr.msk.f32.vlgmr.msra.gmra.mrb[2].mxu0 %vm328_vm1, %v2626_v43 }
 0x749   : > { %2773 = vmatpush3.bf16.xpose.msk.msra.mxu0 %vm3093_vm2, %v2768_v41 }
 0x74a   : > { %v2633_v45 = vpop.f32.mrb[8].mxu0  ;;  %2670 = vmatprep.subr.mxu0 %v309_v27 }
 0x74b   : > { %v1212_v46 = vpop.f32.mrb[9].mxu0 }
 0x74c   : > { %2639 = vmatprep.mubr.msk.f32.mxu0 %vm328_vm1, %v1212_v46 }
 0x74d   : > { %2640 = vmatmul.mubr.msk.f32.gmra.mrb[4].mxu0 %vm328_vm1, %v2633_v45 }
 0x74e   : > { %2653 = vmatprep.mubr.msk.f32.mxu0 %vm328_vm1, %v1414_v47 }
 0x751   : > { %2654 = vmatmul.mubr.msk.f32.vlgmr.msra.gmra.mrb[10].mxu0 %vm328_vm1, %v1416_v48 }
 0x752   : > { %v2648_v49 = vpop.f32.mrb[14].mxu1  ;;  %2671 = vmatpush3.msra.mxu0 %v309_v27 }
 0x753   : > { %v1404_v50 = vpop.f32.mrb[15].mxu1  ;;  %v1507_v51 = vsel %vm501_vm3, %v2648_v49, -inf }
 0x754   : > { %1508 = vmax.xlane.f32.xlu1 %v1507_v51  ;;  %v1504_v52 = vsel %vm501_vm3, %v1404_v50, -inf }
 0x755   : > { %1505 = vmax.xlane.f32.xlu0 %v1504_v52 }
 0x7e1   : > { %v1509_v58 = vpop.xlane.xlu1 %1508 }
 0x7e2   : > { %v1506_v53 = vpop.xlane.xlu0 %1505  ;;  %v1517_v59 = vsub.f32 %v2648_v49, %v1509_v58 }
 0x7e3   : > { %v1516_v54 = vsub.f32 %v1404_v50, %v1506_v53 }
 0x7e4   : > { %v1522_v60 = vmul.f32 1.442695, %v1517_v59 }
 0x7e5   : > { %v1520_v55 = vmul.f32 1.442695, %v1516_v54 }
 0x7e7   : > { %2949 = vpow2.f32 %v1520_v55 }
 0x7e8   : > { %2951 = vpow2.f32 %v1522_v60 }
 0x7f1   : > { %v2950_v56 = vpop.eup %2949 }
 0x7f2   : > { %v1528_v57 = vsel %vm501_vm3, %v2950_v56, 0.0  ;;  %v2952_v1 = vpop.eup %2951 }
 0x7f3   : > { %1529 = vadd.xlane.f32.xlu1 %v1528_v57  ;;  %v1531_v2 = vsel %vm501_vm3, %v2952_v1, 0.0 }
 0x824   : > { %v2655_v61 = vpop.f32.mrb[10].mxu0 }
 0x825   : > { %v1495_v62 = vpop.f32.mrb[11].mxu0  ;;  %v1513_v0 = vsel %vm501_vm3, %v2655_v61, -inf }
 0x826   : > { %v1510_v63 = vsel %vm501_vm3, %v1495_v62, -inf }
 0x827   : > { %1511 = vmax.xlane.f32.xlu0 %v1510_v63 }
 0x82b   : > { %1514 = vmax.xlane.f32.xlu0 %v1513_v0 }
 0x82f   : > { %1532 = vadd.xlane.f32.xlu0 %v1531_v2 }
 0x880   : > { %v1530_v3 = vpop.xlane.xlu1 %1529 }
 0x881   : > { %2953 = vrcp.f32 %v1530_v3 }
 0x88b   : > { %v2954_v4 = vpop.eup %2953 }
 0x88c   : > { %v1541_v5 = vmul.f32 %v2954_v4, %v2950_v56 }
 0x88e   : > { %2660 = vmatprep.mubr.msk.f32.mxu1 %vm501_vm3, %v1541_v5 }
 0x8b4   : > { %v1512_v16 = vpop.xlane.xlu0 %1511 }
 0x8b5   : > { %v1518_v17 = vsub.f32 %v1495_v62, %v1512_v16 }
 0x8b7   : > { %v1524_v18 = vmul.f32 1.442695, %v1518_v17 }
 0x8b8   : > { %v1515_v20 = vpop.xlane.xlu0 %1514 }
 0x8b9   : > { %2955 = vpow2.f32 %v1524_v18  ;;  %v1519_v21 = vsub.f32 %v2655_v61, %v1515_v20 }
 0x8bb   : > { %v1526_v22 = vmul.f32 1.442695, %v1519_v21 }
 0x8bc   : > { %v1533_v28 = vpop.xlane.xlu0 %1532 }
 0x8bd   : > { %2957 = vpow2.f32 %v1526_v22 }
 0x8be   : > { %2959 = vrcp.f32 %v1533_v28 }
 0x8c3   : > { %v2956_v23 = vpop.eup %2955 }
 0x8c4   : > { %v1534_v24 = vsel %vm501_vm3, %v2956_v23, 0.0 }
 0x8c5   : > { %1535 = vadd.xlane.f32.xlu1 %v1534_v24 }
 0x8c7   : > { %v2958_v25 = vpop.eup %2957 }
 0x8c8   : > { %v1537_v26 = vsel %vm501_vm3, %v2958_v25, 0.0  ;;  %v2960_v35 = vpop.eup %2959 }
 0x8c9   : > { %1538 = vadd.xlane.f32.xlu0 %v1537_v26 }
 0x8d6   : > { %2888 = vrot.lane.b32.xlu1 %v3077_v12, %s2996_s16 }
 0x8da   : > { %2898 = vrot.lane.b32.xlu1 %v3077_v12, %s2997_s17 }
 0x8de   : > { %2903 = vrot.lane.b32.xlu1 %v3086_v15, %s2997_s17 }
 0x8df   : > { %2893 = vrot.lane.b32.xlu0 %v3086_v15, %s2996_s16 }
 0x8e2   : > { %1825 = vrot.lane.b32.xlu1 %v3069_v10, %s2998_s20 }
 0x8e3   : > { %1823 = vrot.lane.b32.xlu0 %v3071_v11, %s2998_s20 }
 0x8e6   : > { %1916 = vrot.lane.b32.xlu1 %v3080_v13, %s2998_s20 }
 0x8e7   : > { %1914 = vrot.lane.b32.xlu0 %v3082_v14, %s2998_s20  ;;  %v1543_v14 = vmul.f32 %v2960_v35, %v2952_v1 }
 0x952   : > { %v1536_v29 = vpop.xlane.xlu1 %1535 }
 0x953   : > { %2961 = vrcp.f32 %v1536_v29 }
 0x956   : > { %v2889_v30 = vpop.permute.xlu1 %2888  ;;  %v1539_v31 = vpop.xlane.xlu0 %1538 }
 0x957   : > { %v2891_v32 = vunpack.i.h.bf16 %v2889_v30  ;;  %v2890_v33 = vunpack.i.l.bf16 %v2889_v30  ;;  %2963 = vrcp.f32 %v1539_v31 }
 0x959   : > { %v2774_v34 = vpack.c.bf16 %v2891_v32, %v2890_v33 }
 0x95a   : > { %v2899_v10 = vpop.permute.xlu1 %2898  ;;  %v2894_v36 = vpop.permute.xlu0 %2893 }
 0x95b   : > { %v2901_v37 = vunpack.i.h.bf16 %v2899_v10  ;;  %v2900_v11 = vunpack.i.l.bf16 %v2899_v10  ;;  %v2896_v38 = vunpack.i.h.bf16 %v2894_v36  ;;  %v2895_v39 = vunpack.i.l.bf16 %v2894_v36  ;;  %2775 = vmatprep.subr.bf16.mxu1 %v2774_v34 }
 0x95c   : > { %2777 = vmatpush3.bf16.msra.mxu1 %v2774_v34 }
 0x95d   : > { %v2962_v13 = vpop.eup %2961  ;;  %v2778_v40 = vpack.c.bf16 %v2896_v38, %v2895_v39  ;;  %v2782_v43 = vpack.c.bf16 %v2901_v37, %v2900_v11 }
 0x95e   : > { %v2904_v41 = vpop.permute.xlu1 %2903  ;;  %v1545_v42 = vmul.f32 %v2962_v13, %v2956_v23  ;;  %v1824_v49 = vpop.permute.xlu0 %1823 }
 0x95f   : > { %v2906_v44 = vunpack.i.h.bf16 %v2904_v41  ;;  %v2905_v45 = vunpack.i.l.bf16 %v2904_v41  ;;  %2661 = vmatmul.mubr.msk.f32.vlgmr.msra.gmra.mrb[16].mxu1 %vm501_vm3, %v1543_v14  ;;  %2779 = vmatprep.subr.bf16.mxu1 %v2778_v40 }
 0x960   : > { %2781 = vmatpush3.bf16.msra.mxu1 %v2778_v40  ;;  %2667 = vmatprep.mubr.msk.f32.mxu1 %vm501_vm3, %v1545_v42 }
 0x961   : > { %v2964_v46 = vpop.eup %2963  ;;  %v2788_v47 = vpack.c.bf16 %v2906_v44, %v2905_v45  ;;  %2784 = vmatprep.subr.msk.bf16.mxu1 %vm3093_vm2, %v2782_v43  ;;  %v310_v45 = vld [vmem:[%s3274_s2 + $0x18] sm:$0xff] }
 0x962   : > { %v1547_v48 = vmul.f32 %v2964_v46, %v2958_v25  ;;  %v1826_v50 = vpop.permute.xlu1 %1825  ;;  %v1915_v55 = vpop.permute.xlu0 %1914 }
 0x963   : > { %2790 = vmatprep.subr.msk.bf16.mxu0 %vm3093_vm2, %v2788_v47 }
 0x964   : > { %2668 = vmatmul.mubr.msk.f32.vlgmr.msra.gmra.mrb[18].mxu1 %vm501_vm3, %v1547_v48 }
 0x965   : > { %2682 = vmatprep.mubr.msk.f32.mxu1 %vm328_vm1, %v1824_v49 }
 0x966   : > { %v1917_v56 = vpop.permute.xlu1 %1916 }
 0x969   : > { %2787 = vmatpush3.bf16.xpose.msk.msra.mxu1 %vm3093_vm2, %v2782_v43 }
 0x970   : > { %2683 = vmatmul.mubr.msk.f32.vlgmr.msra.gmra.mrb[20].mxu1 %vm328_vm1, %v1826_v50  ;;  %v2397_v50 = vld [vmem:[%s3275_s3] ss:$0 sm:$0xff] }
 0xa32   : > { %v2662_v51 = vpop.f32.mrb[16].mxu1 }
 0xa33   : > { %v1626_v52 = vpop.f32.mrb[17].mxu1 }
 0xa34   : > { %2672 = vmatprep.mubr.msk.f32.mxu0 %vm328_vm1, %v1626_v52  ;;  %v319_v52 = vadd.f32 %v2397_v50, %v3057_v7 }
 0xa35   : > { %2673 = vmatmul.mubr.msk.f32.vlgmr.msra.gmra.mrb[2].mxu0 %vm328_vm1, %v2662_v51  ;;  %v318_v51 = vadd.f32 %v2397_v50, %v3053_v6 }
 0xa36   : > { %2793 = vmatpush3.bf16.xpose.msk.msra.mxu0 %vm3093_vm2, %v2788_v47 }
 0xa37   : > { %v2669_v53 = vpop.f32.mrb[18].mxu1 }
 0xa38   : > { %v1713_v54 = vpop.f32.mrb[19].mxu1 }
 0xa39   : > { %2675 = vmatprep.mubr.msk.f32.mxu0 %vm328_vm1, %v1713_v54 }
 0xa3a   : > { %2676 = vmatmul.mubr.msk.f32.gmra.mrb[4].mxu0 %vm328_vm1, %v2669_v53 }
 0xa3b   : > { %2689 = vmatprep.mubr.msk.f32.mxu0 %vm328_vm1, %v1915_v55 }
 0xa3e   : > { %2690 = vmatmul.mubr.msk.f32.vlgmr.msra.gmra.mrb[12].mxu0 %vm328_vm1, %v1917_v56 }
 0xa43   : > { %v2684_v57 = vpop.f32.mrb[20].mxu1 }
 0xa44   : > { %v1905_v58 = vpop.f32.mrb[21].mxu1  ;;  %v2008_v59 = vsel %vm501_vm3, %v2684_v57, -inf }
 0xa45   : > { %2009 = vmax.xlane.f32.xlu1 %v2008_v59  ;;  %v2005_v19 = vsel %vm501_vm3, %v1905_v58, -inf }
 0xa46   : > { %2006 = vmax.xlane.f32.xlu0 %v2005_v19 }
 0xad2   : > { %v2010_v1 = vpop.xlane.xlu1 %2009 }
 0xad3   : > { %v2007_v60 = vpop.xlane.xlu0 %2006  ;;  %v2018_v2 = vsub.f32 %v2684_v57, %v2010_v1  ;;  %v320_v57 = vadd.f32 %v2397_v50, %v3059_v8 }
 0xad4   : > { %v2017_v61 = vsub.f32 %v1905_v58, %v2007_v60  ;;  %v321_v58 = vadd.f32 %v2397_v50, %v3065_v9 }
 0xad5   : > { %v2023_v3 = vmul.f32 1.442695, %v2018_v2 }
 0xad6   : > { %v2021_v62 = vmul.f32 1.442695, %v2017_v61 }
 0xad8   : > { %2965 = vpow2.f32 %v2021_v62 }
 0xad9   : > { %2967 = vpow2.f32 %v2023_v3 }
 0xae2   : > { %v2966_v63 = vpop.eup %2965 }
 0xae3   : > { %v2029_v0 = vsel %vm501_vm3, %v2966_v63, 0.0  ;;  %v2968_v18 = vpop.eup %2967 }
 0xae4   : > { %2030 = vadd.xlane.f32.xlu1 %v2029_v0  ;;  %v2032_v20 = vsel %vm501_vm3, %v2968_v18, 0.0 }
 0xb11   : > { %v2691_v4 = vpop.f32.mrb[12].mxu0 }
 0xb12   : > { %v1996_v5 = vpop.f32.mrb[13].mxu0  ;;  %v2014_v17 = vsel %vm501_vm3, %v2691_v4, -inf }
 0xb13   : > { %v2011_v16 = vsel %vm501_vm3, %v1996_v5, -inf }
 0xb14   : > { %2012 = vmax.xlane.f32.xlu0 %v2011_v16 }
 0xb18   : > { %2015 = vmax.xlane.f32.xlu0 %v2014_v17 }
 0xb1c   : > { %2033 = vadd.xlane.f32.xlu0 %v2032_v20 }
 0xb71   : > { %v2031_v21 = vpop.xlane.xlu1 %2030 }
 0xb72   : > { %2969 = vrcp.f32 %v2031_v21 }
 0xb7c   : > { %v2970_v22 = vpop.eup %2969 }
 0xb7d   : > { %v2042_v23 = vmul.f32 %v2970_v22, %v2966_v63 }
 0xb7f   : > { %2696 = vmatprep.mubr.msk.f32.mxu1 %vm501_vm3, %v2042_v23 }
 0xba1   : > { %v2013_v24 = vpop.xlane.xlu0 %2012 }
 0xba2   : > { %v2019_v25 = vsub.f32 %v1996_v5, %v2013_v24 }
 0xba4   : > { %v2025_v26 = vmul.f32 1.442695, %v2019_v25 }
 0xba5   : > { %v2016_v27 = vpop.xlane.xlu0 %2015 }
 0xba6   : > { %2971 = vpow2.f32 %v2025_v26  ;;  %v2020_v28 = vsub.f32 %v2691_v4, %v2016_v27 }
 0xba8   : > { %v2027_v29 = vmul.f32 1.442695, %v2020_v28 }
 0xba9   : > { %v2034_v34 = vpop.xlane.xlu0 %2033 }
 0xbaa   : > { %2973 = vpow2.f32 %v2027_v29 }
 0xbab   : > { %2975 = vrcp.f32 %v2034_v34 }
 0xbb0   : > { %v2972_v30 = vpop.eup %2971 }
 0xbb1   : > { %v2035_v31 = vsel %vm501_vm3, %v2972_v30, 0.0 }
 0xbb2   : > { %2036 = vadd.xlane.f32.xlu1 %v2035_v31 }
 0xbb4   : > { %v2974_v32 = vpop.eup %2973 }
 0xbb5   : > { %v2038_v33 = vsel %vm501_vm3, %v2974_v32, 0.0  ;;  %v2976_v39 = vpop.eup %2975 }
 0xbb6   : > { %2039 = vadd.xlane.f32.xlu0 %v2038_v33 }
 0xbc3   : > { %2908 = vrot.lane.b32.xlu1 %v3077_v12, %s2999_s21  ;;  %v2044_v12 = vmul.f32 %v2976_v39, %v2968_v18 }
 0xbcc   : > { %2913 = vrot.lane.b32.xlu0 %v3086_v15, %s2999_s21 }
 0xc3f   : > { %v2037_v35 = vpop.xlane.xlu1 %2036 }
 0xc40   : > { %2977 = vrcp.f32 %v2037_v35 }
 0xc43   : > { %v2909_v10 = vpop.permute.xlu1 %2908  ;;  %v2040_v36 = vpop.xlane.xlu0 %2039 }
 0xc44   : > { %v2911_v37 = vunpack.i.h.bf16 %v2909_v10  ;;  %v2910_v11 = vunpack.i.l.bf16 %v2909_v10  ;;  %2979 = vrcp.f32 %v2040_v36 }
 0xc46   : > { %v2794_v38 = vpack.c.bf16 %v2911_v37, %v2910_v11 }
 0xc47   : > { %v2914_v13 = vpop.permute.xlu0 %2913 }
 0xc48   : > { %v2916_v14 = vunpack.i.h.bf16 %v2914_v13  ;;  %v2915_v40 = vunpack.i.l.bf16 %v2914_v13  ;;  %2795 = vmatprep.subr.bf16.mxu1 %v2794_v38 }
 0xc49   : > { %2797 = vmatpush3.bf16.msra.mxu1 %v2794_v38 }
 0xc4a   : > { %v2978_v41 = vpop.eup %2977  ;;  %v2798_v42 = vpack.c.bf16 %v2916_v14, %v2915_v40 }
 0xc4b   : > { %v2046_v15 = vmul.f32 %v2978_v41, %v2972_v30 }
 0xc4c   : > { %2697 = vmatmul.mubr.msk.f32.vlgmr.msra.gmra.mrb[22].mxu1 %vm501_vm3, %v2044_v12  ;;  %2799 = vmatprep.subr.bf16.mxu0 %v2798_v42 }
 0xc4d   : > { %2801 = vmatpush3.bf16.msra.mxu0 %v2798_v42  ;;  %2703 = vmatprep.mubr.msk.f32.mxu0 %vm501_vm3, %v2046_v15 }
 0xc4e   : > { %v2980_v43 = vpop.eup %2979  ;;  %2706 = vmatprep.subr.mxu0 %v310_v45 }
 0xc4f   : > { %v2048_v44 = vmul.f32 %v2980_v43, %v2974_v32 }
 0xc51   : > { %2704 = vmatmul.mubr.msk.f32.vlgmr.msra.gmra.mrb[14].mxu0 %vm501_vm3, %v2048_v44 }
 0xc52   : > { %2707 = vmatpush3.msra.mxu0 %v310_v45 }
 0xd1f   : > { %v2698_v46 = vpop.f32.mrb[22].mxu1 }
 0xd20   : > { %v2127_v47 = vpop.f32.mrb[23].mxu1 }
 0xd21   : > { %2708 = vmatprep.mubr.msk.f32.mxu0 %vm328_vm1, %v2127_v47 }
 0xd22   : > { %2709 = vmatmul.mubr.msk.f32.vlgmr.msra.gmra.mrb[2].mxu0 %vm328_vm1, %v2698_v46 }
 0xd24   : > { %v2705_v48 = vpop.f32.mrb[14].mxu0 }
 0xd25   : > { %v2214_v49 = vpop.f32.mrb[15].mxu0 }
 0xd26   : > { %2711 = vmatprep.mubr.msk.f32.mxu0 %vm328_vm1, %v2214_v49 }
 0xd27   : > { %2712 = vmatmul.mubr.msk.f32.gmra.mrb[4].mxu0 %vm328_vm1, %v2705_v48 }
 0xdf5   : > { %v2710_v53 = vpop.f32.mrb[2].mxu0 }
 0xdf6   : > { %v2301_v54 = vpop.f32.mrb[3].mxu0  ;;  %v2802_v56 = vadd.f32 %v2710_v53, %v319_v52 }
 0xdf7   : > { %v2803_v55 = vadd.f32 %v2301_v54, %v318_v51 }
 0xdf8   : > { %2325 = vst.msk [vmem:[%s199_s30 + $0x8] sm:$0xff] %vm209_vm0, %v2802_v56 }
 0xdf9   : > { %2324 = vst.msk [vmem:[%s199_s30] sm:$0xff] %vm209_vm0, %v2803_v55 }
 0xdfa   : > { %v2713_v6 = vpop.f32.mrb[4].mxu0 }
 0xdfb   : > { %v2311_v59 = vpop.f32.mrb[5].mxu0  ;;  %v2804_v19 = vadd.f32 %v2713_v6, %v321_v58 }
 0xdfc   : > { %v2805_v7 = vadd.f32 %v2311_v59, %v320_v57 }
 0xdfd   : > { %2327 = vst.msk [vmem:[%s199_s30 + $0x18] sm:$0xff] %vm209_vm0, %v2804_v19 }
 0xdfe   : > { %2326 = vst.msk [vmem:[%s199_s30 + $0x10] sm:$0xff] %vm209_vm0, %v2805_v7 }
 0xdff PF: > { %s14_s15 = sadd.s32 1, %s2987_s15  }
 0xe00   : > { %p11_p4 = scmp.ge.s32.totalorder %s14_s15, 4  }
 0xe02   :  { %13 = sbr.rel (!%p11_p4) target bundleno = 1 (0x1), region = 66 }

</bundles_post_ra>
